<compile_context>
chip_gen: v6e
topology: v6e:2x2x1
jax: 0.10.0
libtpu: 0.0.40
codegen_flags: <defaults>
</compile_context>

<pallas_src>
import math

import jax
import jax.numpy as jnp
from jax.experimental import pallas as pl
from jax.experimental.pallas import tpu as pltpu

# ----------------------------- model sizes ---------------------------------
BATCH = 128          # rows of the input (PyTorch batch)
ROW_TILE = 64        # rows per grid step (multiple of 8)
D_IN = 16            # input_dim
HIDDEN = 256         # hidden_dim (module default)
D_OUT = 8            # output_dim (> 0 -> output_layer present)
OUT_PAD = 128        # lane-dense padded output width
WX_COLS = 2 * HIDDEN + OUT_PAD   # fused x-side weight width: [W1 | W2x | W3x_pad]
ROWS_A = 24          # D_IN weight rows + 1 bias row, padded up to a multiple of 8
SQUASH_OUTPUT = False            # module default (nn.Tanh only if True)

assert D_IN + 1 <= ROWS_A and BATCH % ROW_TILE == 0 and ROW_TILE % 8 == 0


# ------------------------------- kernel -------------------------------------
def dense_mlp_kernel(x_ref, slab_a_ref, slab_b_ref, o_ref):
    x = x_ref[...].astype(jnp.float32)                        # (ROW_TILE, D_IN)

    # Fused x-side projection: one matmul covers layer_1, the x-part of
    # layer_2 and the x-part of output_layer; one broadcast add covers all
    # three biases.
    wx = slab_a_ref[pl.ds(0, D_IN), :]                        # (D_IN, 2H+128)
    bias = slab_a_ref[pl.ds(D_IN, 1), :]                      # (1,    2H+128)
    proj = jnp.dot(x, wx, preferred_element_type=jnp.float32) + bias

    h1 = jnp.maximum(proj[:, 0:HIDDEN], 0.0)                  # relu(layer_1)
    p2x = proj[:, HIDDEN:2 * HIDDEN]                          # x @ W2_x + b2
    p3x = proj[:, 2 * HIDDEN:WX_COLS]                         # x @ W3_x + b3 (zero-padded)

    # layer_2: cat([out_1, x]) @ W2 == out_1 @ W2_h + (x @ W2_x + b2)
    w2h = slab_b_ref[pl.ds(0, HIDDEN), :]                     # (H, H)
    out2 = jnp.maximum(
        jnp.dot(h1, w2h, preferred_element_type=jnp.float32) + p2x, 0.0)

    # output_layer: cat([out_2, x]) @ W3 == out_2 @ W3_h + (x @ W3_x + b3)
    w3h = slab_b_ref[pl.ds(HIDDEN, HIDDEN), pl.ds(0, OUT_PAD)]  # (H, 128), cols >= D_OUT are zero
    out3 = jnp.dot(out2, w3h, preferred_element_type=jnp.float32) + p3x

    if SQUASH_OUTPUT:  # static flag; module default is False
        out3 = jnp.tanh(out3)

    o_ref[...] = out3.astype(o_ref.dtype)


# --------------------------- parameter handling ------------------------------
def make_params(key):
    """Torch-style fan-in uniform init, weights stored pre-transposed (x @ W)."""
    ks = jax.random.split(key, 3)

    def lin(k, fan_in, fan_out):
        bound = 1.0 / math.sqrt(fan_in)
        kw, kb = jax.random.split(k)
        w = jax.random.uniform(kw, (fan_in, fan_out), jnp.float32, -bound, bound)
        b = jax.random.uniform(kb, (fan_out,), jnp.float32, -bound, bound)
        return w, b

    w1, b1 = lin(ks[0], D_IN, HIDDEN)                 # layer_1
    w2, b2 = lin(ks[1], HIDDEN + D_IN, HIDDEN)        # layer_2 (rows 0:H <- out_1, rows H:H+D <- x)
    w3, b3 = lin(ks[2], HIDDEN + D_IN, D_OUT)         # output_layer
    return (w1, b1, w2, b2, w3, b3)


def pack_params(params):
    """Pack the 6 tensors into 2 lane-padded slabs (2 DMAs total)."""
    w1, b1, w2, b2, w3, b3 = params

    slab_a = jnp.zeros((ROWS_A, WX_COLS), jnp.float32)
    slab_a = slab_a.at[0:D_IN, 0:HIDDEN].set(w1)                                # W1
    slab_a = slab_a.at[0:D_IN, HIDDEN:2 * HIDDEN].set(w2[HIDDEN:, :])           # W2_x
    slab_a = slab_a.at[0:D_IN, 2 * HIDDEN:2 * HIDDEN + D_OUT].set(w3[HIDDEN:, :])  # W3_x
    slab_a = slab_a.at[D_IN, 0:HIDDEN].set(b1)                                  # b1
    slab_a = slab_a.at[D_IN, HIDDEN:2 * HIDDEN].set(b2)                         # b2
    slab_a = slab_a.at[D_IN, 2 * HIDDEN:2 * HIDDEN + D_OUT].set(b3)             # b3

    slab_b = jnp.zeros((2 * HIDDEN, HIDDEN), jnp.float32)
    slab_b = slab_b.at[0:HIDDEN, :].set(w2[0:HIDDEN, :])                        # W2_h
    slab_b = slab_b.at[HIDDEN:2 * HIDDEN, 0:D_OUT].set(w3[0:HIDDEN, :])         # W3_h (zero-padded)
    return slab_a, slab_b


# ------------------------------- wrapper -------------------------------------
@jax.jit
def dense_mlp(x, slab_a, slab_b):
    flops = 2 * BATCH * (D_IN * WX_COLS + HIDDEN * HIDDEN + HIDDEN * OUT_PAD)
    bytes_accessed = 4 * (x.size + slab_a.size + slab_b.size + BATCH * OUT_PAD)

    out_padded = pl.pallas_call(
        dense_mlp_kernel,
        out_shape=jax.ShapeDtypeStruct((BATCH, OUT_PAD), jnp.float32),
        grid=(BATCH // ROW_TILE,),
        in_specs=[
            pl.BlockSpec((ROW_TILE, D_IN), lambda i: (i, 0)),       # activations: tiled over rows
            pl.BlockSpec((ROWS_A, WX_COLS), lambda i: (0, 0)),      # packed x-side weights + biases
            pl.BlockSpec((2 * HIDDEN, HIDDEN), lambda i: (0, 0)),   # packed hidden-side weights
        ],
        out_specs=pl.BlockSpec((ROW_TILE, OUT_PAD), lambda i: (i, 0)),
        compiler_params=pltpu.CompilerParams(
            dimension_semantics=("parallel",)),
        cost_estimate=pl.CostEstimate(
            flops=flops, transcendentals=0, bytes_accessed=bytes_accessed),
    )(x, slab_a, slab_b)
    return out_padded[:, :D_OUT]


# ------------------------------ reference ------------------------------------
def reference(x, params):
    w1, b1, w2, b2, w3, b3 = params
    hp = jax.lax.Precision.HIGHEST
    out1 = jnp.maximum(jnp.dot(x, w1, precision=hp) + b1, 0.0)
    in2 = jnp.concatenate([out1, x], axis=1)
    out2 = jnp.maximum(jnp.dot(in2, w2, precision=hp) + b2, 0.0)
    in3 = jnp.concatenate([out2, x], axis=1)
    out3 = jnp.dot(in3, w3, precision=hp) + b3
    if SQUASH_OUTPUT:
        out3 = jnp.tanh(out3)
    return out3
# TODO(synk): output_dim < 0 branch (return out_2 directly) is not exercised;
# this script implements the output_dim > 0 head with squash_output=False.


if __name__ == "__main__":
    key = jax.random.PRNGKey(0)
    kx, kp = jax.random.split(key)
    x = jax.random.normal(kx, (BATCH, D_IN), jnp.float32)
    params = make_params(kp)
    slab_a, slab_b = pack_params(params)

    out = dense_mlp(x, slab_a, slab_b)
    out = jax.block_until_ready(out)

    ref = reference(x, params)
    assert out.shape == (BATCH, D_OUT)
    assert jnp.allclose(out, ref, atol=2e-4, rtol=2e-4), "mismatch vs JAX reference"

    print("KERNEL_OK")
</pallas_src>

<mosaic_0001>
module attributes {stable_mosaic.version = 11 : i64} {
  func.func @dense_mlp_kernel(%arg0: i32, %arg1: memref<64x16xf32, #tpu.memory_space<vmem>>, %arg2: memref<24x640xf32, #tpu.memory_space<vmem>>, %arg3: memref<512x256xf32, #tpu.memory_space<vmem>>, %arg4: memref<64x128xf32, #tpu.memory_space<vmem>>) attributes {dimension_semantics = [#tpu.dimension_semantics<parallel>], iteration_bounds = array<i64: 2>, scalar_prefetch = 0 : i64, scratch_operands = 0 : i64, tpu.core_type = #tpu.core_type<tc>, window_params = [{transform_indices = @transform_0, window_bounds = array<i64: 64, 16>}, {pipeline_mode = #tpu.pipeline_mode<synchronous>, transform_indices = @transform_1, window_bounds = array<i64: 24, 640>}, {pipeline_mode = #tpu.pipeline_mode<synchronous>, transform_indices = @transform_2, window_bounds = array<i64: 512, 256>}, {transform_indices = @transform_3, window_bounds = array<i64: 64, 128>}]} {
    %c0 = arith.constant 0 : index
    %c0_0 = arith.constant 0 : index
    %0 = vector.load %arg1[%c0, %c0_0] : memref<64x16xf32, #tpu.memory_space<vmem>>, vector<64x16xf32>
    %c0_1 = arith.constant 0 : index
    %c0_2 = arith.constant 0 : index
    %1 = vector.load %arg2[%c0_1, %c0_2] : memref<24x640xf32, #tpu.memory_space<vmem>>, vector<16x640xf32>
    %c16 = arith.constant 16 : index
    %c0_3 = arith.constant 0 : index
    %2 = vector.load %arg2[%c16, %c0_3] : memref<24x640xf32, #tpu.memory_space<vmem>>, vector<1x640xf32>
    %cst = arith.constant dense<0.000000e+00> : vector<64x640xf32>
    %3 = tpu.matmul %0, %1, %cst {dimension_numbers = #tpu.dot_dimension_numbers<[1], [0], [0], [1], [0, 0, 1, 1], [], []>} : vector<64x16xf32>, vector<16x640xf32>, vector<64x640xf32> -> vector<64x640xf32>
    %4 = vector.broadcast %2 : vector<1x640xf32> to vector<64x640xf32>
    %5 = arith.addf %3, %4 : vector<64x640xf32>
    %6 = vector.extract_strided_slice %5 {offsets = [0, 0], sizes = [64, 256], strides = [1, 1]} : vector<64x640xf32> to vector<64x256xf32>
    %cst_4 = arith.constant 0.000000e+00 : f32
    %7 = vector.broadcast %cst_4 : f32 to vector<64x256xf32>
    %8 = arith.maximumf %6, %7 : vector<64x256xf32>
    %9 = vector.extract_strided_slice %5 {offsets = [0, 256], sizes = [64, 256], strides = [1, 1]} : vector<64x640xf32> to vector<64x256xf32>
    %10 = vector.extract_strided_slice %5 {offsets = [0, 512], sizes = [64, 128], strides = [1, 1]} : vector<64x640xf32> to vector<64x128xf32>
    %c0_5 = arith.constant 0 : index
    %c0_6 = arith.constant 0 : index
    %11 = vector.load %arg3[%c0_5, %c0_6] : memref<512x256xf32, #tpu.memory_space<vmem>>, vector<256x256xf32>
    %cst_7 = arith.constant dense<0.000000e+00> : vector<64x256xf32>
    %12 = tpu.matmul %8, %11, %cst_7 {dimension_numbers = #tpu.dot_dimension_numbers<[1], [0], [0], [1], [0, 0, 1, 1], [], []>} : vector<64x256xf32>, vector<256x256xf32>, vector<64x256xf32> -> vector<64x256xf32>
    %13 = arith.addf %12, %9 : vector<64x256xf32>
    %cst_8 = arith.constant 0.000000e+00 : f32
    %14 = vector.broadcast %cst_8 : f32 to vector<64x256xf32>
    %15 = arith.maximumf %13, %14 : vector<64x256xf32>
    %c256 = arith.constant 256 : index
    %c0_9 = arith.constant 0 : index
    %16 = vector.load %arg3[%c256, %c0_9] : memref<512x256xf32, #tpu.memory_space<vmem>>, vector<256x128xf32>
    %cst_10 = arith.constant dense<0.000000e+00> : vector<64x128xf32>
    %17 = tpu.matmul %15, %16, %cst_10 {dimension_numbers = #tpu.dot_dimension_numbers<[1], [0], [0], [1], [0, 0, 1, 1], [], []>} : vector<64x256xf32>, vector<256x128xf32>, vector<64x128xf32> -> vector<64x128xf32>
    %18 = arith.addf %17, %10 : vector<64x128xf32>
    %c0_11 = arith.constant 0 : index
    %c0_12 = arith.constant 0 : index
    %19 = vector.load %arg4[%c0_11, %c0_12] : memref<64x128xf32, #tpu.memory_space<vmem>>, vector<64x128xf32>
    tpu.vector_store %arg4[%c0_11, %c0_12], %18 {strides = array<i32>} : memref<64x128xf32, #tpu.memory_space<vmem>>, vector<64x128xf32>,
    return
  }
  func.func @transform_0(%arg0: i32) -> (i32, i32) {
    %c0_i32 = arith.constant 0 : i32
    %c0_i32_0 = arith.constant 0 : i32
    return %arg0, %c0_i32 : i32, i32
  }
  func.func @transform_1(%arg0: i32) -> (i32, i32) {
    %c0_i32 = arith.constant 0 : i32
    %c0_i32_0 = arith.constant 0 : i32
    %c0_i32_1 = arith.constant 0 : i32
    return %c0_i32, %c0_i32_0 : i32, i32
  }
  func.func @transform_2(%arg0: i32) -> (i32, i32) {
    %c0_i32 = arith.constant 0 : i32
    %c0_i32_0 = arith.constant 0 : i32
    %c0_i32_1 = arith.constant 0 : i32
    return %c0_i32, %c0_i32_0 : i32, i32
  }
  func.func @transform_3(%arg0: i32) -> (i32, i32) {
    %c0_i32 = arith.constant 0 : i32
    %c0_i32_0 = arith.constant 0 : i32
    return %arg0, %c0_i32 : i32, i32
  }
}

</mosaic_0001>

<bundles_post_ra>
// kernel: dense_mlp.1
= control target key start
LH: loop header
LB: loop body
LE: loop exit
PB: predicated region body
PF: predicated region fallthrough
CT: control target
= control target key end

     0   :  { %8 = vsyncpa [#allocation3], 0  ;;  %s1220_s12 = smov 0   ;;  %s1447_s0 = inlined_call_operand.vmem [shape: f32[128,16], index: 0, kind: input, shape index: {}]   ;;  %s1448_s1 = inlined_call_operand.vmem [shape: f32[24,640], index: 1, kind: input, shape index: {}]   ;;  %s1449_s2 = inlined_call_operand.hbm [shape: f32[512,256], index: 2, kind: input, shape index: {}]   ;;  %s1450_s3 = inlined_call_operand.vmem [shape: f32[128,128], index: 3, kind: output, shape index: {}]  }
   0x1 LB: > { %s1015_s13 = sadd.s32 4294967295, %s1194_s12   ;;  %p1017_p0 = scmp.ge.s32.totalorder %s1194_s12, 1  ;;  %s1194_s12 = sphi %s1220_s12, %s14_s12  }
   0x2   : > { %p113_p1 = scmp.lt.s32.totalorder %s1194_s12, 3  ;;  %s1196_s14 = smov [#allocation2]  }
   0x3   : > { %s128_s15 = sshll.u32 %s1196_s14, 4  ;;  %p1232_p3 = scmp.eq.s32.totalorder %s1015_s13, 0  ;;  %s129_s15 = int_to_ptr.vmem [resolvable:$true] %s128_s15 }
   0x4   : > { %p1228_p2 = pnand %p1017_p0, %p113_p1  ;;  %s1169_s18 = scalar_lea.vmem %s129_s15, 16384 }
   0x5   : > { %p1170_p7 = scmp.ne.s32.totalorder %s129_s15, %s1169_s18  ;;  %p1177_p10 = scmp.lt.s32.totalorder %s129_s15, %s129_s15 }
   0x6   : > { %p1140_p4 = pneg %p1228_p2  ;;  %p1178_p11 = scmp.lt.s32.totalorder %s1169_s18, %s1169_s18 }
   0x8   : > { %p1141_p5 = pnand %p1232_p3, %p1140_p4  ;;  %p1179_p12 = por %p1178_p11, %p1177_p10 }
   0xa   : > { %p1160_p6 = pneg %p1141_p5 }
   0xc   : > { %p1172_p8 = pnand %p1170_p7, %p1160_p6 }
   0xe   : > { %p1173_p9 = pneg %p1172_p8 }
  0x10   : > { %p1180_p13 = pnand %p1179_p12, %p1173_p9 }
  0x12   : > { %1183 = shalt.err (!%p1180_p13)
}
  0x13   : > { %s1197_s19 = smov 256   ;;  %s1198_s20 = smov 16  }
  0x14   : > { %1143 = dma.hbm_to_vmem [thread:$0]  (!%p1141_p5), %s1449_s2, 16384, %s129_s15, [#allocation3], %s1197_s19, %s1197_s19, %s1198_s20  }
  0x15   : > { %153 = sbr.rel (%p1228_p2) target bundleno = 662 (0x296), region = 32 }
  0x1a   : > { %1189 = dma.done.wait (%p1232_p3), [#allocation3], 16384  }
  0x1b   : > { %1191 = vsyncadd (%p1232_p3), [#allocation3], 4294950912  ;;  %s1022_s23 = sshll.u32 %s1015_s13, 3  ;;  %v1199_v0 = vmov 0.0   ;;  %v203_v1 = vld [vmem:[%s1448_s1 + $0x30] sm:$0xff]  ;;  %v202_v2 = vld [vmem:[%s1448_s1 + $0x28] sm:$0xff] }
  0x1c   : > { %326 = vmatprep.mubr.f32.mxu0 %v1199_v0  ;;  %p178_p0 = scmp.lt.s32.totalorder %s1022_s23, 15  ;;  %439 = vmatprep.mubr.f32.mxu1 %v1199_v0  ;;  %v198_v3 = vld [vmem:[%s1448_s1 + $0x8] sm:$0xff]  ;;  %v197_v4 = vld [vmem:[%s1448_s1] sm:$0xff]  ;;  %vm237_vm0 = vcmask 130048   ;;  %v204_v7 = vld [vmem:[%s1448_s1 + $0x38] sm:$0xff] }
  0x1d   : > { %290 = vmatprep.subr.mxu0 %v203_v1  ;;  %v205_v6 = vld [vmem:[%s1448_s1 + $0x40] sm:$0xff]  ;;  %v200_v8 = vld [vmem:[%s1448_s1 + $0x18] sm:$0xff]  ;;  %v199_v9 = vld [vmem:[%s1448_s1 + $0x10] sm:$0xff] }
  0x1e   : > { %s1454_s23 = smov (!%p178_p0, %s1022_s23), 15  ;;  %291 = vmatpush1.msra.mxu0 %v202_v2  ;;  %403 = vmatprep.subr.mxu1 %v205_v6  ;;  %v640_v11 = vld [vmem:[#allocation2 + $0xf8] sm:$0xff]  ;;  %v639_v12 = vld [vmem:[#allocation2 + $0xf0] sm:$0xff]  ;;  %v638_v13 = vld [vmem:[#allocation2 + $0xe8] sm:$0xff] }
  0x1f   : > { %s1023_s24 = sshll.u32 %s1454_s23, 3  ;;  %292 = vmatprep.subr.mxu0 %v198_v3  ;;  %404 = vmatpush1.msra.mxu1 %v204_v7  ;;  %v637_v15 = vld [vmem:[#allocation2 + $0xe0] sm:$0xff]  ;;  %v636_v16 = vld [vmem:[#allocation2 + $0xd8] sm:$0xff]  ;;  %v635_v17 = vld [vmem:[#allocation2 + $0xd0] sm:$0xff] }
  0x20   : > { %s1259_s27 = scalar_lea.vmem %s1447_s0, %s1023_s24  ;;  %293 = vmatpush1.msra.mxu0 %v197_v4  ;;  %405 = vmatprep.subr.mxu1 %v200_v8  ;;  %v634_v18 = vld [vmem:[#allocation2 + $0xc8] sm:$0xff]  ;;  %v633_v20 = vld [vmem:[#allocation2 + $0xc0] sm:$0xff]  ;;  %v632_v21 = vld [vmem:[#allocation2 + $0xb8] sm:$0xff]  ;;  %s1434_s30 = scalar_lea.vmem %s1450_s3, %s1023_s24 }
  0x21   : > { %v1274_v5 = vld [vmem:[%s1259_s27] sm:$0xff]  ;;  %v1292_v10 = vld [vmem:[%s1259_s27 + $0x8] sm:$0xff]  ;;  %406 = vmatpush1.msra.mxu1 %v199_v9  ;;  %v1300_v14 = vld [vmem:[%s1259_s27 + $0x10] sm:$0xff] }
  0x22   : > { %1028 = vmatmul.mubr.msk.f32.vlgmr.msra.gmra.mxu0 %vm237_vm0, %v1274_v5  ;;  %1036 = vmatmul.mubr.msk.f32.vlgmr.msra.gmra.mxu1 %vm237_vm0, %v1274_v5  ;;  %v1307_v19 = vld [vmem:[%s1259_s27 + $0x18] sm:$0xff]  ;;  %v631_v22 = vld [vmem:[#allocation2 + $0xb0] sm:$0xff]  ;;  %v630_v23 = vld [vmem:[#allocation2 + $0xa8] sm:$0xff] }
  0x23   : > { %332 = vmatprep.mubr.f32.mxu0 %v1199_v0  ;;  %673 = vmatprep.subr.mxu1 %v640_v11  ;;  %v1315_v24 = vld [vmem:[%s1259_s27 + $0x20] sm:$0xff]  ;;  %v628_v26 = vld [vmem:[#allocation2 + $0x98] sm:$0xff]  ;;  %v627_v27 = vld [vmem:[#allocation2 + $0x90] sm:$0xff] }
  0x24   : > { %674 = vmatpush1.msra.mxu1 %v639_v12  ;;  %445 = vmatprep.mubr.f32.mxu1 %v1199_v0  ;;  %v629_v25 = vld [vmem:[#allocation2 + $0xa0] sm:$0xff]  ;;  %v626_v28 = vld [vmem:[#allocation2 + $0x88] sm:$0xff]  ;;  %v624_v31 = vld [vmem:[#allocation2 + $0x78] sm:$0xff] }
  0x25   : > { %675 = vmatprep.subr.mxu1 %v638_v13  ;;  %v1324_v29 = vld [vmem:[%s1259_s27 + $0x28] sm:$0xff]  ;;  %v625_v30 = vld [vmem:[#allocation2 + $0x80] sm:$0xff]  ;;  %v623_v32 = vld [vmem:[#allocation2 + $0x70] sm:$0xff] }
  0x26   : > { %1029 = vmatmul.mubr.msk.f32.gmra.mxu0 %vm237_vm0, %v1292_v10  ;;  %676 = vmatpush1.msra.mxu1 %v637_v15  ;;  %v622_v33 = vld [vmem:[#allocation2 + $0x68] sm:$0xff]  ;;  %v1333_v34 = vld [vmem:[%s1259_s27 + $0x30] sm:$0xff]  ;;  %v621_v35 = vld [vmem:[#allocation2 + $0x60] sm:$0xff] }
  0x27   : > { %338 = vmatprep.mubr.f32.mxu0 %v1199_v0  ;;  %677 = vmatprep.subr.mxu1 %v636_v16  ;;  %v620_v36 = vld [vmem:[#allocation2 + $0x58] sm:$0xff]  ;;  %v619_v37 = vld [vmem:[#allocation2 + $0x50] sm:$0xff]  ;;  %v618_v38 = vld [vmem:[#allocation2 + $0x48] sm:$0xff] }
  0x28   : > { %678 = vmatpush1.msra.mxu1 %v635_v17  ;;  %v1342_v39 = vld [vmem:[%s1259_s27 + $0x38] sm:$0xff]  ;;  %v617_v40 = vld [vmem:[#allocation2 + $0x40] sm:$0xff]  ;;  %v615_v42 = vld [vmem:[#allocation2 + $0x30] sm:$0xff] }
  0x29   : > { %679 = vmatprep.subr.mxu1 %v634_v18  ;;  %1037 = vmatmul.mubr.msk.f32.gmra.mxu1 %vm237_vm0, %v1292_v10  ;;  %v616_v41 = vld [vmem:[#allocation2 + $0x38] sm:$0xff]  ;;  %v614_v43 = vld [vmem:[#allocation2 + $0x28] sm:$0xff]  ;;  %v613_v44 = vld [vmem:[#allocation2 + $0x20] sm:$0xff] }
  0x2a   : > { %1030 = vmatmul.mubr.msk.f32.gmra.mxu0 %vm237_vm0, %v1300_v14  ;;  %680 = vmatpush1.msra.mxu1 %v633_v20  ;;  %v612_v45 = vld [vmem:[#allocation2 + $0x18] sm:$0xff]  ;;  %v611_v46 = vld [vmem:[#allocation2 + $0x10] sm:$0xff]  ;;  %v610_v47 = vld [vmem:[#allocation2 + $0x8] sm:$0xff] }
  0x2b   : > { %344 = vmatprep.mubr.f32.mxu0 %v1199_v0  ;;  %681 = vmatprep.subr.mxu1 %v632_v21  ;;  %v609_v48 = vld [vmem:[#allocation2] sm:$0xff]  ;;  %v672_v49 = vld [vmem:[#allocation2 + $0x1f8] sm:$0xff]  ;;  %v671_v50 = vld [vmem:[#allocation2 + $0x1f0] sm:$0xff] }
  0x2c   : > { %682 = vmatpush1.msra.mxu1 %v631_v22  ;;  %451 = vmatprep.mubr.f32.mxu1 %v1199_v0  ;;  %v670_v51 = vld [vmem:[#allocation2 + $0x1e8] sm:$0xff]  ;;  %v669_v52 = vld [vmem:[#allocation2 + $0x1e0] sm:$0xff]  ;;  %v668_v53 = vld [vmem:[#allocation2 + $0x1d8] sm:$0xff] }
  0x2d   : > { %683 = vmatprep.subr.mxu1 %v630_v23  ;;  %1038 = vmatmul.mubr.msk.f32.gmra.mxu1 %vm237_vm0, %v1300_v14  ;;  %v667_v54 = vld [vmem:[#allocation2 + $0x1d0] sm:$0xff]  ;;  %v666_v55 = vld [vmem:[#allocation2 + $0x1c8] sm:$0xff]  ;;  %v665_v56 = vld [vmem:[#allocation2 + $0x1c0] sm:$0xff] }
  0x2e   : > { %1031 = vmatmul.mubr.msk.f32.gmra.mxu0 %vm237_vm0, %v1307_v19  ;;  %684 = vmatpush1.msra.mxu1 %v629_v25  ;;  %v664_v57 = vld [vmem:[#allocation2 + $0x1b8] sm:$0xff]  ;;  %v663_v58 = vld [vmem:[#allocation2 + $0x1b0] sm:$0xff]  ;;  %v662_v59 = vld [vmem:[#allocation2 + $0x1a8] sm:$0xff] }
  0x2f   : > { %350 = vmatprep.mubr.f32.mxu0 %v1199_v0  ;;  %685 = vmatprep.subr.mxu1 %v628_v26  ;;  %v661_v60 = vld [vmem:[#allocation2 + $0x1a0] sm:$0xff]  ;;  %v660_v61 = vld [vmem:[#allocation2 + $0x198] sm:$0xff]  ;;  %v659_v62 = vld [vmem:[#allocation2 + $0x190] sm:$0xff] }
  0x30   : > { %686 = vmatpush1.msra.mxu1 %v627_v27  ;;  %457 = vmatprep.mubr.f32.mxu1 %v1199_v0  ;;  %v658_v63 = vld [vmem:[#allocation2 + $0x188] sm:$0xff]  ;;  %v656_v1 = vld [vmem:[#allocation2 + $0x178] sm:$0xff]  ;;  %v655_v2 = vld [vmem:[#allocation2 + $0x170] sm:$0xff] }
  0x31   : > { %687 = vmatprep.subr.mxu1 %v626_v28  ;;  %1039 = vmatmul.mubr.msk.f32.gmra.mxu1 %vm237_vm0, %v1307_v19  ;;  %v654_v3 = vld [vmem:[#allocation2 + $0x168] sm:$0xff]  ;;  %v653_v4 = vld [vmem:[#allocation2 + $0x160] sm:$0xff]  ;;  %v651_v6 = vld [vmem:[#allocation2 + $0x150] sm:$0xff] }
  0x32   : > { %1032 = vmatmul.mubr.msk.f32.gmra.mxu0 %vm237_vm0, %v1315_v24  ;;  %688 = vmatpush1.msra.mxu1 %v625_v30  ;;  %v650_v7 = vld [vmem:[#allocation2 + $0x148] sm:$0xff]  ;;  %v649_v8 = vld [vmem:[#allocation2 + $0x140] sm:$0xff]  ;;  %v648_v9 = vld [vmem:[#allocation2 + $0x138] sm:$0xff] }
  0x33   : > { %356 = vmatprep.mubr.f32.mxu0 %v1199_v0  ;;  %689 = vmatprep.subr.mxu1 %v624_v31  ;;  %v647_v11 = vld [vmem:[#allocation2 + $0x130] sm:$0xff]  ;;  %v646_v12 = vld [vmem:[#allocation2 + $0x128] sm:$0xff]  ;;  %v645_v13 = vld [vmem:[#allocation2 + $0x120] sm:$0xff] }
  0x34   : > { %690 = vmatpush1.msra.mxu1 %v623_v32  ;;  %463 = vmatprep.mubr.f32.mxu1 %v1199_v0  ;;  %v644_v15 = vld [vmem:[#allocation2 + $0x118] sm:$0xff]  ;;  %v643_v16 = vld [vmem:[#allocation2 + $0x110] sm:$0xff]  ;;  %v642_v17 = vld [vmem:[#allocation2 + $0x108] sm:$0xff] }
  0x35   : > { %691 = vmatprep.subr.mxu1 %v622_v33  ;;  %1040 = vmatmul.mubr.msk.f32.gmra.mxu1 %vm237_vm0, %v1315_v24  ;;  %v641_v18 = vld [vmem:[#allocation2 + $0x100] sm:$0xff]  ;;  %v206_v20 = vld [vmem:[%s1448_s1 + $0x48] sm:$0xff]  ;;  %v833_v22 = vld [vmem:[#allocation2 + $0x3f0] sm:$0xff] }
  0x36   : > { %1033 = vmatmul.mubr.msk.f32.gmra.mxu0 %vm237_vm0, %v1324_v29  ;;  %692 = vmatpush1.msra.mxu1 %v621_v35  ;;  %v201_v21 = vld [vmem:[%s1448_s1 + $0x20] sm:$0xff]  ;;  %v817_v23 = vld [vmem:[#allocation2 + $0x2f0] sm:$0xff] }
  0x37   : > { %362 = vmatprep.mubr.f32.mxu0 %v1199_v0  ;;  %693 = vmatprep.subr.mxu1 %v620_v36  ;;  %v832_v25 = vld [vmem:[#allocation2 + $0x3e0] sm:$0xff]  ;;  %v831_v27 = vld [vmem:[#allocation2 + $0x3d0] sm:$0xff] }
  0x38   : > { %694 = vmatpush1.msra.mxu1 %v619_v37  ;;  %469 = vmatprep.mubr.f32.mxu1 %v1199_v0  ;;  %v816_v26 = vld [vmem:[#allocation2 + $0x2e0] sm:$0xff]  ;;  %v815_v28 = vld [vmem:[#allocation2 + $0x2d0] sm:$0xff] }
  0x39   : > { %695 = vmatprep.subr.mxu1 %v618_v38  ;;  %1041 = vmatmul.mubr.msk.f32.gmra.mxu1 %vm237_vm0, %v1324_v29  ;;  %v830_v30 = vld [vmem:[#allocation2 + $0x3c0] sm:$0xff]  ;;  %v829_v32 = vld [vmem:[#allocation2 + $0x3b0] sm:$0xff] }
  0x3a   : > { %1034 = vmatmul.mubr.msk.f32.gmra.mxu0 %vm237_vm0, %v1333_v34  ;;  %696 = vmatpush1.msra.mxu1 %v617_v40  ;;  %v814_v31 = vld [vmem:[#allocation2 + $0x2c0] sm:$0xff]  ;;  %v827_v35 = vld [vmem:[#allocation2 + $0x390] sm:$0xff] }
  0x3b   : > { %368 = vmatprep.mubr.f32.mxu0 %v1199_v0  ;;  %697 = vmatprep.subr.mxu1 %v616_v41  ;;  %v828_v33 = vld [vmem:[#allocation2 + $0x3a0] sm:$0xff]  ;;  %v825_v37 = vld [vmem:[#allocation2 + $0x370] sm:$0xff] }
  0x3c   : > { %475 = vmatprep.mubr.f32.mxu1 %v1199_v0  ;;  %698 = vmatpush1.msra.mxu1 %v615_v42  ;;  %v826_v36 = vld [vmem:[#allocation2 + $0x380] sm:$0xff]  ;;  %v809_v38 = vld [vmem:[#allocation2 + $0x270] sm:$0xff] }
  0x3d   : > { %699 = vmatprep.subr.mxu1 %v614_v43  ;;  %1042 = vmatmul.mubr.msk.f32.gmra.mxu1 %vm237_vm0, %v1333_v34  ;;  %v808_v40 = vld [vmem:[#allocation2 + $0x260] sm:$0xff]  ;;  %v823_v41 = vld [vmem:[#allocation2 + $0x350] sm:$0xff] }
  0x3e   : > { %1035 = vmatmul.mubr.msk.f32.gmra.mxu0 %vm237_vm0, %v1342_v39  ;;  %700 = vmatpush1.msra.mxu1 %v613_v44  ;;  %v822_v42 = vld [vmem:[#allocation2 + $0x340] sm:$0xff] }
  0x3f   : > { %1124 = vmatprep.mubr.msk.f32.mxu0 %vm237_vm0, %v1274_v5  ;;  %481 = vmatprep.mubr.f32.mxu1 %v1199_v0  ;;  %v657_v0 = vld [vmem:[#allocation2 + $0x180] sm:$0xff]  ;;  %v652_v5 = vld [vmem:[#allocation2 + $0x158] sm:$0xff] }
  0x40   : > { %701 = vmatprep.subr.mxu1 %v612_v45  ;;  %1120 = vmatprep.subr.mxu0 %v206_v20  ;;  %v806_v43 = vld [vmem:[#allocation2 + $0x240] sm:$0xff] }
  0x41   : > { %702 = vmatpush1.msra.mxu1 %v611_v46  ;;  %1121 = vmatpush3.msra.mxu0 %v206_v20  ;;  %v1026_v45 = vld [vmem:[%s1448_s1 + $0x50] ss:$8 sm:$0xf] }
  0x42   : > { %703 = vmatprep.subr.mxu1 %v610_v47  ;;  %1043 = vmatmul.mubr.msk.f32.gmra.mxu1 %vm237_vm0, %v1342_v39  ;;  %v1027_v46 = vld [vmem:[%s1448_s1 + $0x50] ss:$8 sm:$0x10] }
  0x43   : > { %704 = vmatpush1.msra.mxu1 %v609_v48  ;;  %1122 = vmatprep.subr.mxu0 %v201_v21  ;;  %v1385_v47 = vor.u32 %v1027_v46, %v1026_v45 }
  0x44   : > { %705 = vmatprep.subr.mxu1 %v672_v49  ;;  %1123 = vmatpush3.msra.mxu0 %v201_v21 }
  0x45   : > { %706 = vmatpush2.msra.mxu1 %v671_v50  ;;  %1125 = vmatmul.mubr.msk.f32.vlgmr.msra.gmra.mxu0 %vm237_vm0, %v1292_v10  ;;  %v813_v10 = vld [vmem:[#allocation2 + $0x2b0] sm:$0xff] }
  0x46   : > { %707 = vmatprep.subr.mxu1 %v670_v51  ;;  %1064 = vmatprep.subr.mxu0 %v833_v22 }
  0x47   : > { %708 = vmatpush2.msra.mxu1 %v669_v52  ;;  %1065 = vmatpush3.msra.mxu0 %v817_v23 }
  0x48   : > { %709 = vmatprep.subr.mxu1 %v668_v53  ;;  %1127 = vmatprep.mubr.msk.f32.mxu0 %vm237_vm0, %v1300_v14  ;;  %v812_v14 = vld [vmem:[#allocation2 + $0x2a0] sm:$0xff] }
  0x49   : > { %710 = vmatpush2.msra.mxu1 %v667_v54  ;;  %1066 = vmatprep.subr.mxu0 %v832_v25 }
  0x4a   : > { %711 = vmatprep.subr.mxu1 %v666_v55  ;;  %1067 = vmatpush3.msra.mxu0 %v816_v26 }
  0x4b   : > { %712 = vmatpush2.msra.mxu1 %v665_v56  ;;  %1068 = vmatprep.subr.mxu0 %v831_v27 }
  0x4c   : > { %713 = vmatprep.subr.mxu1 %v664_v57  ;;  %1128 = vmatmul.mubr.msk.f32.gmra.mxu0 %vm237_vm0, %v1307_v19  ;;  %v811_v19 = vld [vmem:[#allocation2 + $0x290] sm:$0xff] }
  0x4d   : > { %714 = vmatpush2.msra.mxu1 %v663_v58  ;;  %1069 = vmatpush3.msra.mxu0 %v815_v28 }
  0x4e   : > { %715 = vmatprep.subr.mxu1 %v662_v59  ;;  %1130 = vmatprep.mubr.msk.f32.mxu0 %vm237_vm0, %v1315_v24  ;;  %v810_v24 = vld [vmem:[#allocation2 + $0x280] sm:$0xff] }
  0x4f   : > { %716 = vmatpush2.msra.mxu1 %v661_v60  ;;  %1070 = vmatprep.subr.mxu0 %v830_v30 }
  0x50   : > { %717 = vmatprep.subr.mxu1 %v660_v61  ;;  %1071 = vmatpush3.msra.mxu0 %v814_v31 }
  0x51   : > { %718 = vmatpush2.msra.mxu1 %v659_v62  ;;  %1072 = vmatprep.subr.mxu0 %v829_v32 }
  0x52   : > { %719 = vmatprep.subr.mxu1 %v658_v63  ;;  %1131 = vmatmul.mubr.msk.f32.gmra.mxu0 %vm237_vm0, %v1324_v29  ;;  %v824_v29 = vld [vmem:[#allocation2 + $0x360] sm:$0xff] }
  0x53   : > { %720 = vmatpush2.msra.mxu1 %v657_v0  ;;  %1073 = vmatpush3.msra.mxu0 %v813_v10 }
  0x54   : > { %721 = vmatprep.subr.mxu1 %v656_v1  ;;  %1133 = vmatprep.mubr.msk.f32.mxu0 %vm237_vm0, %v1333_v34  ;;  %v807_v34 = vld [vmem:[#allocation2 + $0x250] sm:$0xff] }
  0x55   : > { %722 = vmatpush2.msra.mxu1 %v655_v2  ;;  %1074 = vmatprep.subr.mxu0 %v828_v33 }
  0x56   : > { %723 = vmatprep.subr.mxu1 %v654_v3  ;;  %1075 = vmatpush3.msra.mxu0 %v812_v14 }
  0x57   : > { %724 = vmatpush2.msra.mxu1 %v653_v4  ;;  %1076 = vmatprep.subr.mxu0 %v827_v35 }
  0x58   : > { %725 = vmatprep.subr.mxu1 %v652_v5  ;;  %1134 = vmatmul.mubr.msk.f32.gmra.mxu0 %vm237_vm0, %v1342_v39  ;;  %v212_v39 = vlaneseq }
  0x59   : > { %726 = vmatpush2.msra.mxu1 %v651_v6  ;;  %1077 = vmatpush3.msra.mxu0 %v811_v19 }
  0x5a   : > { %727 = vmatprep.subr.mxu1 %v650_v7  ;;  %1078 = vmatprep.subr.mxu0 %v826_v36  ;;  %v1377_v44 = vshrl.u32 %v212_v39, 7  ;;  %v802_v39 = vld [vmem:[#allocation2 + $0x200] sm:$0xff] }
  0x5b   : > { %728 = vmatpush2.msra.mxu1 %v649_v8  ;;  %1079 = vmatpush3.msra.mxu0 %v810_v24 }
  0x5c   : > { %729 = vmatprep.subr.mxu1 %v648_v9  ;;  %1080 = vmatprep.subr.mxu0 %v825_v37  ;;  %v214_v48 = vsub.s32 0, %v1377_v44  ;;  %v218_v49 = vsub.s32 1, %v1377_v44 }
  0x5d   : > { %730 = vmatpush2.msra.mxu1 %v647_v11  ;;  %1081 = vmatpush3.msra.mxu0 %v809_v38  ;;  %v821_v38 = vld [vmem:[#allocation2 + $0x330] sm:$0xff] }
  0x5e   : > { %731 = vmatprep.subr.mxu1 %v646_v12  ;;  %1082 = vmatprep.subr.mxu0 %v824_v29  ;;  %v215_v50 = vrot.slane %v1385_v47, %v214_v48  ;;  %v219_v51 = vrot.slane %v1385_v47, %v218_v49  ;;  %v805_v29 = vld [vmem:[#allocation2 + $0x230] sm:$0xff] }
  0x5f   : > { %732 = vmatpush2.msra.mxu1 %v645_v13  ;;  %1083 = vmatpush3.msra.mxu0 %v808_v40  ;;  %v820_v40 = vld [vmem:[#allocation2 + $0x320] sm:$0xff] }
  0x60   : > { %733 = vmatprep.subr.mxu1 %v644_v15  ;;  %1084 = vmatprep.subr.mxu0 %v823_v41  ;;  %v804_v41 = vld [vmem:[#allocation2 + $0x220] sm:$0xff] }
  0x61   : > { %734 = vmatpush2.msra.mxu1 %v643_v16  ;;  %1085 = vmatpush3.msra.mxu0 %v807_v34  ;;  %v819_v34 = vld [vmem:[#allocation2 + $0x310] sm:$0xff] }
  0x62   : > { %735 = vmatprep.subr.mxu1 %v642_v17  ;;  %1086 = vmatprep.subr.mxu0 %v822_v42  ;;  %v803_v42 = vld [vmem:[#allocation2 + $0x210] sm:$0xff] }
  0x63   : > { %736 = vmatpush2.msra.mxu1 %v641_v18  ;;  %1087 = vmatpush3.msra.mxu0 %v806_v43  ;;  %v818_v43 = vld [vmem:[#allocation2 + $0x300] sm:$0xff] }
  0x64   : > { %1088 = vmatprep.subr.mxu0 %v821_v38 }
  0x65   : > { %1089 = vmatpush3.msra.mxu0 %v805_v29 }
  0x66   : > { %1090 = vmatprep.subr.mxu0 %v820_v40 }
  0x67   : > { %1091 = vmatpush3.msra.mxu0 %v804_v41 }
  0x68   : > { %1092 = vmatprep.subr.mxu0 %v819_v34 }
  0x69   : > { %1093 = vmatpush3.msra.mxu0 %v803_v42 }
  0x6a   : > { %1094 = vmatprep.subr.mxu0 %v818_v43 }
  0x6b   : > { %1095 = vmatpush3.msra.mxu0 %v802_v39 }
  0xe2   : > { %v328_v52 = vpop.f32.mrf.mxu0  ;;  %v441_v45 = vpop.f32.mrf.mxu1 }
  0xe3   : > { %v329_v53 = vadd.f32 %v328_v52, %v215_v50 }
  0xe4   : > { %v330_v54 = vpop.f32.mrf.mxu0  ;;  %v443_v46 = vpop.f32.mrf.mxu1 }
  0xe5   : > { %v331_v55 = vadd.f32 %v330_v54, %v219_v51  ;;  %v593_v58 = vmax.f32 %v329_v53, 0.0 }
  0xe6   : > { %v334_v56 = vpop.f32.mrf.mxu0 }
  0xe7   : > { %v594_v57 = vmax.f32 %v331_v55, 0.0  ;;  %v335_v59 = vadd.f32 %v334_v56, %v215_v50 }
  0xe8   : > { %v336_v60 = vpop.f32.mrf.mxu0 }
  0xe9   : > { %v337_v61 = vadd.f32 %v336_v60, %v219_v51  ;;  %737 = vmatprep.mubr.f32.mxu1 %v594_v57  ;;  %v595_v0 = vmax.f32 %v335_v59, 0.0  ;;  %v447_v48 = vpop.f32.mrf.mxu1  ;;  %v222_v60 = vsub.s32 2, %v1377_v44 }
  0xea   : > { %v340_v62 = vpop.f32.mrf.mxu0  ;;  %738 = vmatmul.mubr.f32.vlgmr.msra.gmra.mxu1 %v593_v58 }
  0xeb   : > { %v596_v63 = vmax.f32 %v337_v61, 0.0  ;;  %v341_v1 = vadd.f32 %v340_v62, %v215_v50  ;;  %v449_v49 = vpop.f32.mrf.mxu1  ;;  %v226_v61 = vsub.s32 3, %v1377_v44 }
  0xec   : > { %v342_v2 = vpop.f32.mrf.mxu0 }
  0xed   : > { %v343_v3 = vadd.f32 %v342_v2, %v219_v51  ;;  %743 = vmatprep.mubr.f32.mxu1 %v596_v63  ;;  %v597_v6 = vmax.f32 %v341_v1, 0.0  ;;  %v1400_v63 = vrot.slane %v1385_v47, %v222_v60 }
  0xee   : > { %v346_v4 = vpop.f32.mrf.mxu0  ;;  %744 = vmatmul.mubr.f32.gmra.mxu1 %v595_v0  ;;  %v1403_v0 = vrot.slane %v1385_v47, %v226_v61 }
  0xef   : > { %v598_v5 = vmax.f32 %v343_v3, 0.0  ;;  %v347_v7 = vadd.f32 %v346_v4, %v215_v50  ;;  %v442_v2 = vadd.f32 %v441_v45, %v1400_v63 }
  0xf0   : > { %v348_v8 = vpop.f32.mrf.mxu0  ;;  %v444_v4 = vadd.f32 %v443_v46, %v1403_v0 }
  0xf1   : > { %v349_v9 = vadd.f32 %v348_v8, %v219_v51  ;;  %749 = vmatprep.mubr.f32.mxu1 %v598_v5  ;;  %v599_v13 = vmax.f32 %v347_v7, 0.0  ;;  %v448_v8 = vadd.f32 %v447_v48, %v1400_v63 }
  0xf2   : > { %v352_v11 = vpop.f32.mrf.mxu0  ;;  %750 = vmatmul.mubr.f32.gmra.mxu1 %v597_v6 }
  0xf3   : > { %v600_v12 = vmax.f32 %v349_v9, 0.0  ;;  %v353_v15 = vadd.f32 %v352_v11, %v215_v50  ;;  %v450_v11 = vadd.f32 %v449_v49, %v1403_v0 }
  0xf4   : > { %v354_v16 = vpop.f32.mrf.mxu0 }
  0xf5   : > { %v355_v17 = vadd.f32 %v354_v16, %v219_v51  ;;  %755 = vmatprep.mubr.f32.mxu1 %v600_v12  ;;  %v601_v21 = vmax.f32 %v353_v15, 0.0 }
  0xf6   : > { %v358_v18 = vpop.f32.mrf.mxu0  ;;  %756 = vmatmul.mubr.f32.gmra.mxu1 %v599_v13 }
  0xf7   : > { %v602_v20 = vmax.f32 %v355_v17, 0.0  ;;  %v359_v22 = vadd.f32 %v358_v18, %v215_v50 }
  0xf8   : > { %v360_v23 = vpop.f32.mrf.mxu0 }
  0xf9   : > { %v361_v25 = vadd.f32 %v360_v23, %v219_v51  ;;  %761 = vmatprep.mubr.f32.mxu1 %v602_v20  ;;  %v603_v28 = vmax.f32 %v359_v22, 0.0 }
  0xfa   : > { %v364_v26 = vpop.f32.mrf.mxu0  ;;  %762 = vmatmul.mubr.f32.gmra.mxu1 %v601_v21 }
  0xfb   : > { %v604_v27 = vmax.f32 %v361_v25, 0.0  ;;  %v365_v30 = vadd.f32 %v364_v26, %v215_v50 }
  0xfc   : > { %v366_v31 = vpop.f32.mrf.mxu0 }
  0xfd   : > { %v367_v32 = vadd.f32 %v366_v31, %v219_v51  ;;  %767 = vmatprep.mubr.f32.mxu1 %v604_v27  ;;  %v605_v14 = vmax.f32 %v365_v30, 0.0 }
  0xfe   : > { %v370_v10 = vpop.f32.mrf.mxu0  ;;  %768 = vmatmul.mubr.f32.gmra.mxu1 %v603_v28 }
  0xff   : > { %v606_v33 = vmax.f32 %v367_v32, 0.0  ;;  %v371_v35 = vadd.f32 %v370_v10, %v215_v50  ;;  %v453_v50 = vpop.f32.mrf.mxu1 }
 0x100   : > { %v372_v19 = vpop.f32.mrf.mxu0  ;;  %v454_v18 = vadd.f32 %v453_v50, %v1400_v63 }
 0x101   : > { %v373_v36 = vadd.f32 %v372_v19, %v219_v51  ;;  %773 = vmatprep.mubr.f32.mxu1 %v606_v33  ;;  %v607_v37 = vmax.f32 %v371_v35, 0.0  ;;  %v455_v51 = vpop.f32.mrf.mxu1 }
 0x102   : > { %774 = vmatmul.mubr.f32.gmra.mxu1 %v605_v14  ;;  %v456_v21 = vadd.f32 %v455_v51, %v1403_v0 }
 0x103   : > { %v608_v24 = vmax.f32 %v373_v36, 0.0  ;;  %v459_v52 = vpop.f32.mrf.mxu1 }
 0x104   : > { %v460_v28 = vadd.f32 %v459_v52, %v1400_v63 }
 0x105   : > { %779 = vmatprep.mubr.f32.mxu1 %v608_v24  ;;  %v461_v53 = vpop.f32.mrf.mxu1 }
 0x106   : > { %780 = vmatmul.mubr.f32.gmra.mxu1 %v607_v37  ;;  %v462_v31 = vadd.f32 %v461_v53, %v1403_v0 }
 0x107   : > { %v465_v54 = vpop.f32.mrf.mxu1 }
 0x108   : > { %v466_v19 = vadd.f32 %v465_v54, %v1400_v63 }
 0x109   : > { %v467_v55 = vpop.f32.mrf.mxu1 }
 0x10a   : > { %v468_v24 = vadd.f32 %v467_v55, %v1403_v0 }
 0x10b   : > { %v471_v56 = vpop.f32.mrf.mxu1 }
 0x10c   : > { %v472_v34 = vadd.f32 %v471_v56, %v1400_v63 }
 0x10d   : > { %v473_v57 = vpop.f32.mrf.mxu1 }
 0x10e   : > { %v474_v43 = vadd.f32 %v473_v57, %v1403_v0 }
 0x10f   : > { %v1391_v58 = vpop.f32.mrf.mxu1 }
 0x110   : > { %v478_v50 = vadd.f32 %v1391_v58, %v1400_v63 }
 0x111   : > { %v1393_v59 = vpop.f32.mrf.mxu1 }
 0x112   : > { %v480_v52 = vadd.f32 %v1393_v59, %v1403_v0 }
 0x113   : > { %v1397_v62 = vpop.f32.mrf.mxu1 }
 0x114   : > { %v484_v57 = vadd.f32 %v1397_v62, %v1400_v63 }
 0x115   : > { %v1405_v1 = vpop.f32.mrf.mxu1 }
 0x1aa   : > { %v739_v3 = vpop.f32.mrf.mxu1 }
 0x1ab   : > { %v740_v5 = vadd.f32 %v739_v3, %v442_v2  ;;  %v486_v2 = vadd.f32 %v1405_v1, %v1403_v0  ;;  %v230_v0 = vsub.s32 4, %v1377_v44 }
 0x1ac   : > { %v741_v6 = vpop.f32.mrf.mxu1 }
 0x1ad   : > { %v742_v7 = vadd.f32 %v741_v6, %v444_v4  ;;  %v786_v13 = vmax.f32 %v740_v5, 0.0 }
 0x1ae   : > { %v745_v9 = vpop.f32.mrf.mxu1 }
 0x1af   : > { %v787_v12 = vmax.f32 %v742_v7, 0.0  ;;  %v746_v15 = vadd.f32 %v745_v9, %v448_v8  ;;  %v1126_v8 = vpop.f32.mrf.mxu0 }
 0x1b0   : > { %v747_v16 = vpop.f32.mrf.mxu1 }
 0x1b1   : > { %v748_v17 = vadd.f32 %v747_v16, %v450_v11  ;;  %898 = vmatprep.mubr.f32.mxu0 %v787_v12  ;;  %v788_v23 = vmax.f32 %v746_v15, 0.0  ;;  %v554_v9 = vpop.f32.mrf.mxu0  ;;  %v231_v15 = vrot.slane %v1385_v47, %v230_v0 }
 0x1b2   : > { %v751_v20 = vpop.f32.mrf.mxu1  ;;  %899 = vmatmul.mubr.f32.vlgmr.msra.gmra.mxu0 %v786_v13 }
 0x1b3   : > { %v789_v22 = vmax.f32 %v748_v17, 0.0  ;;  %v752_v25 = vadd.f32 %v751_v20, %v454_v18  ;;  %v1129_v62 = vpop.f32.mrf.mxu0  ;;  %v555_v18 = vadd.f32 %v554_v9, %v231_v15  ;;  %v560_v44 = vadd.f32 %v1126_v8, %v231_v15 }
 0x1b4   : > { %v753_v26 = vpop.f32.mrf.mxu1 }
 0x1b5   : > { %v754_v27 = vadd.f32 %v753_v26, %v456_v21  ;;  %903 = vmatprep.mubr.f32.mxu0 %v789_v22  ;;  %v790_v10 = vmax.f32 %v752_v25, 0.0  ;;  %v564_v63 = vpop.f32.mrf.mxu0 }
 0x1b6   : > { %v757_v30 = vpop.f32.mrf.mxu1  ;;  %904 = vmatmul.mubr.f32.gmra.mxu0 %v788_v23 }
 0x1b7   : > { %v791_v32 = vmax.f32 %v754_v27, 0.0  ;;  %v758_v33 = vadd.f32 %v757_v30, %v460_v28  ;;  %v1132_v11 = vpop.f32.mrf.mxu0  ;;  %v565_v28 = vadd.f32 %v564_v63, %v231_v15 }
 0x1b8   : > { %v759_v14 = vpop.f32.mrf.mxu1 }
 0x1b9   : > { %v760_v35 = vadd.f32 %v759_v14, %v462_v31  ;;  %908 = vmatprep.mubr.f32.mxu0 %v791_v32  ;;  %v792_v38 = vmax.f32 %v758_v33, 0.0  ;;  %v574_v12 = vpop.f32.mrf.mxu0  ;;  %v570_v33 = vadd.f32 %v1129_v62, %v231_v15 }
 0x1ba   : > { %v763_v36 = vpop.f32.mrf.mxu1  ;;  %909 = vmatmul.mubr.f32.gmra.mxu0 %v790_v10 }
 0x1bb   : > { %v793_v37 = vmax.f32 %v760_v35, 0.0  ;;  %v764_v29 = vadd.f32 %v763_v36, %v466_v19  ;;  %v1135_v13 = vpop.f32.mrf.mxu0 }
 0x1bc   : > { %v765_v40 = vpop.f32.mrf.mxu1 }
 0x1bd   : > { %v766_v41 = vadd.f32 %v765_v40, %v468_v24  ;;  %913 = vmatprep.mubr.f32.mxu0 %v793_v37  ;;  %v794_v45 = vmax.f32 %v764_v29, 0.0  ;;  %v584_v1 = vpop.f32.mrf.mxu0  ;;  %v575_v24 = vadd.f32 %v574_v12, %v231_v15 }
 0x1be   : > { %v769_v42 = vpop.f32.mrf.mxu1  ;;  %914 = vmatmul.mubr.f32.gmra.mxu0 %v792_v38 }
 0x1bf   : > { %v795_v39 = vmax.f32 %v766_v41, 0.0  ;;  %v770_v46 = vadd.f32 %v769_v42, %v472_v34  ;;  %v580_v41 = vadd.f32 %v1132_v11, %v231_v15 }
 0x1c0   : > { %v771_v48 = vpop.f32.mrf.mxu1 }
 0x1c1   : > { %v772_v49 = vadd.f32 %v771_v48, %v474_v43  ;;  %918 = vmatprep.mubr.f32.mxu0 %v795_v39  ;;  %v796_v54 = vmax.f32 %v770_v46, 0.0 }
 0x1c2   : > { %v775_v51 = vpop.f32.mrf.mxu1  ;;  %919 = vmatmul.mubr.f32.gmra.mxu0 %v794_v45  ;;  %v585_v45 = vadd.f32 %v584_v1, %v231_v15 }
 0x1c3   : > { %v797_v53 = vmax.f32 %v772_v49, 0.0  ;;  %v776_v55 = vadd.f32 %v775_v51, %v478_v50  ;;  %v590_v51 = vadd.f32 %v1135_v13, %v231_v15 }
 0x1c4   : > { %v777_v56 = vpop.f32.mrf.mxu1 }
 0x1c5   : > { %v778_v60 = vadd.f32 %v777_v56, %v480_v52  ;;  %923 = vmatprep.mubr.f32.mxu0 %v797_v53  ;;  %v798_v3 = vmax.f32 %v776_v55, 0.0 }
 0x1c6   : > { %v781_v61 = vpop.f32.mrf.mxu1  ;;  %924 = vmatmul.mubr.f32.gmra.mxu0 %v796_v54 }
 0x1c7   : > { %v799_v58 = vmax.f32 %v778_v60, 0.0  ;;  %v782_v4 = vadd.f32 %v781_v61, %v484_v57 }
 0x1c8   : > { %v783_v5 = vpop.f32.mrf.mxu1 }
 0x1c9   : > { %v784_v6 = vadd.f32 %v783_v5, %v486_v2  ;;  %928 = vmatprep.mubr.f32.mxu0 %v799_v58  ;;  %v800_v7 = vmax.f32 %v782_v4, 0.0 }
 0x1ca   : > { %929 = vmatmul.mubr.f32.gmra.mxu0 %v798_v3 }
 0x1cb   : > { %v801_v59 = vmax.f32 %v784_v6, 0.0 }
 0x1cd   : > { %933 = vmatprep.mubr.f32.mxu0 %v801_v59 }
 0x1ce   : > { %934 = vmatmul.mubr.f32.gmra.mxu0 %v800_v7 }
 0x272   : > { %v1096_v16 = vpop.f32.mrf.mxu0 }
 0x274   : > { %v1097_v17 = vpop.f32.mrf.mxu0 }
 0x275   : > { %v1098_v20 = vadd.f32 %v1097_v17, %v1096_v16 }
 0x276   : > { %v1099_v21 = vpop.f32.mrf.mxu0 }
 0x277   : > { %v901_v22 = vadd.f32 %v1098_v20, %v555_v18 }
 0x278   : > { %v1100_v23 = vpop.f32.mrf.mxu0 }
 0x279   : > { %939 = vst [vmem:[%s1434_s30] sm:$0xff] %v901_v22  ;;  %v1101_v25 = vadd.f32 %v1100_v23, %v1099_v21 }
 0x27a   : > { %v1102_v47 = vpop.f32.mrf.mxu0 }
 0x27b   : > { %v906_v26 = vadd.f32 %v1101_v25, %v560_v44 }
 0x27c   : > { %v1103_v27 = vpop.f32.mrf.mxu0 }
 0x27d   : > { %940 = vst [vmem:[%s1434_s30 + $0x8] sm:$0xff] %v906_v26  ;;  %v1104_v30 = vadd.f32 %v1103_v27, %v1102_v47 }
 0x27e   : > { %v1105_v31 = vpop.f32.mrf.mxu0 }
 0x27f   : > { %v911_v32 = vadd.f32 %v1104_v30, %v565_v28 }
 0x280   : > { %v1106_v10 = vpop.f32.mrf.mxu0 }
 0x281   : > { %941 = vst [vmem:[%s1434_s30 + $0x10] sm:$0xff] %v911_v32  ;;  %v1107_v14 = vadd.f32 %v1106_v10, %v1105_v31 }
 0x282   : > { %v1108_v35 = vpop.f32.mrf.mxu0 }
 0x283   : > { %v916_v19 = vadd.f32 %v1107_v14, %v570_v33 }
 0x284   : > { %v1109_v36 = vpop.f32.mrf.mxu0 }
 0x285   : > { %942 = vst [vmem:[%s1434_s30 + $0x18] sm:$0xff] %v916_v19  ;;  %v1110_v37 = vadd.f32 %v1109_v36, %v1108_v35 }
 0x286   : > { %v1111_v38 = vpop.f32.mrf.mxu0 }
 0x287   : > { %v921_v29 = vadd.f32 %v1110_v37, %v575_v24 }
 0x288   : > { %v1112_v40 = vpop.f32.mrf.mxu0 }
 0x289   : > { %943 = vst [vmem:[%s1434_s30 + $0x20] sm:$0xff] %v921_v29  ;;  %v1113_v34 = vadd.f32 %v1112_v40, %v1111_v38 }
 0x28a   : > { %v1114_v42 = vpop.f32.mrf.mxu0 }
 0x28b   : > { %v926_v43 = vadd.f32 %v1113_v34, %v580_v41 }
 0x28c   : > { %v1115_v39 = vpop.f32.mrf.mxu0 }
 0x28d   : > { %944 = vst [vmem:[%s1434_s30 + $0x28] sm:$0xff] %v926_v43  ;;  %v1116_v46 = vadd.f32 %v1115_v39, %v1114_v42 }
 0x28e   : > { %v1117_v48 = vpop.f32.mrf.mxu0 }
 0x28f   : > { %v931_v49 = vadd.f32 %v1116_v46, %v585_v45 }
 0x290   : > { %v1118_v50 = vpop.f32.mrf.mxu0 }
 0x291   : > { %945 = vst [vmem:[%s1434_s30 + $0x30] sm:$0xff] %v931_v49  ;;  %v1119_v52 = vadd.f32 %v1118_v50, %v1117_v48 }
 0x293   : > { %v936_v53 = vadd.f32 %v1119_v52, %v590_v51 }
 0x295   : > { %946 = vst [vmem:[%s1434_s30 + $0x38] sm:$0xff] %v936_v53 }
 0x296 PF: > { %s14_s12 = sadd.s32 1, %s1194_s12  }
 0x297   : > { %p11_p1 = scmp.ge.s32.totalorder %s14_s12, 4  }
 0x299   :  { %13 = sbr.rel (!%p11_p1) target bundleno = 1 (0x1), region = 68 }
 0x29e   :  { %969 = vsyncpa [#allocation3], 1 }
 0x29f   :  { %971 = vsyncpa [#allocation3 + $0x1], 1 }

</bundles_post_ra>
